<compile_context>
chip_gen: v7x
topology: tpu7x:2x2x1
jax: 0.10.0
libtpu: 0.0.40
codegen_flags: <defaults>
</compile_context>

<pallas_src>
import functools

import jax
import jax.numpy as jnp
from jax.experimental import pallas as pl
from jax.experimental.pallas import tpu as pltpu

_LANE = 128
_SUB = 8
_GROUP = _SUB * _LANE               # 1024 elements per (8, 128) vreg group
_X_TILE_BYTES = 8 * 1024 * 1024     # ~8 MiB of x per spatial tile (review: 4-8 MiB)


def _cdiv(a, b):
    return -(-a // b)


def _dice_kernel(x_ref, t_ref, inter_ref, union_ref, *, groups_rem):
    """Partial dice sums for one (sample, spatial-tile) grid point.

    x_ref:      (1, C, Gt, 8, 128)  model-output tile (native float dtype)
    t_ref:      (1, 1, Gt, 8, 128)  class-index tile (native int dtype)
    inter_ref:  (1, C, 8, 128) f32  resident accumulator of sum_{t==c} x
    union_ref:  (1, C, 8, 128) f32  resident accumulator of sum x^2 + sum 1[t==c]
    groups_rem: static int; #valid (8,128) groups in the LAST spatial tile
                (0 => every tile is fully valid, no masking needed)
    """
    g = pl.program_id(1)

    @pl.when(g == 0)
    def _():
        inter_ref[...] = jnp.zeros_like(inter_ref)
        union_ref[...] = jnp.zeros_like(union_ref)

    C = x_ref.shape[1]
    Gt = x_ref.shape[2]
    zero = jnp.zeros((), x_ref.dtype)

    def accumulate(valid_groups):
        x = x_ref[...]                       # (1, C, Gt, 8, 128), native dtype
        t = t_ref[...]                       # (1, 1, Gt, 8, 128), native int dtype

        # Tiny per-channel iota, compared in the target's (narrow) dtype; the broadcast
        # happens inside the compare -- no (C, S) one-hot temp is ever materialized.
        ch = jax.lax.broadcasted_iota(jnp.int32, (1, C, 1, 1, 1), 1).astype(t.dtype)
        m = t == ch                          # (1, C, Gt, 8, 128) bool

        if valid_groups is not None:
            # Ragged tail: groups past the end of the array were never DMA'd (garbage);
            # knock out whole (8, 128) groups beyond the valid count.
            g_io = jax.lax.broadcasted_iota(jnp.int32, (1, 1, Gt, 1, 1), 2)
            valid = g_io < valid_groups
            m = jnp.logical_and(m, valid)
            x = jnp.where(valid, x, zero)

        xm = jnp.where(m, x, zero)           # native-dtype select (bf16 stays packed)
        x32 = x.astype(jnp.float32)          # f32 squares / f32 accumulation

        # Sum only over the group axis: pure elementwise vreg adds (VPU slot), no XLU.
        inter_ref[...] += jnp.sum(xm.astype(jnp.float32), axis=2)
        union_ref[...] += (jnp.sum(x32 * x32, axis=2)
                           + jnp.sum(m.astype(jnp.float32), axis=2))

    if groups_rem == 0:
        accumulate(None)
    else:
        last = pl.num_programs(1) - 1

        @pl.when(g != last)
        def _():
            accumulate(None)

        @pl.when(g == last)
        def _():
            accumulate(groups_rem)


def dice_loss(output, target, *, x_tile_bytes=_X_TILE_BYTES):
    """output: (N, C, *spatial) float, target: (N, 1, *spatial) int -> scalar loss."""
    N, C = output.shape[0], output.shape[1]
    S = 1
    for d in output.shape[2:]:
        S *= d

    x = output.reshape(N, C, S)              # free reshape, keep native dtype
    t = target.reshape(N, 1, S)
    if (t.dtype not in (jnp.int8, jnp.int16, jnp.int32)) or \
       (t.dtype == jnp.int8 and C > 127):
        t = t.astype(jnp.int32)

    # View S as GR groups of (8, 128).  Pad (one HBM copy of x) ONLY when the layout
    # forces it: S not a multiple of 1024.  The common case streams straight from HBM
    # with zero extra copies; GR-vs-tile raggedness is masked inside the kernel.
    GR = max(_cdiv(S, _GROUP), 1)
    S_aligned = GR * _GROUP
    if S_aligned != S:
        # x padded with 0 (adds nothing to sum x^2); target with -1 (matches no class).
        x = jnp.pad(x, ((0, 0), (0, 0), (0, S_aligned - S)))
        t = jnp.pad(t, ((0, 0), (0, 0), (0, S_aligned - S)), constant_values=-1)

    x5 = x.reshape(N, C, GR, _SUB, _LANE)    # free split of the last dim
    t5 = t.reshape(N, 1, GR, _SUB, _LANE)

    # Groups per spatial tile: ~x_tile_bytes of x per tile (double-buffered by Pallas).
    x_item = jnp.dtype(x.dtype).itemsize
    t_item = jnp.dtype(t.dtype).itemsize
    Gt = x_tile_bytes // max(1, C * _GROUP * x_item)
    Gt = max(1, min(Gt, GR))
    n_tiles = _cdiv(GR, Gt)
    groups_rem = GR - (n_tiles - 1) * Gt
    if groups_rem == Gt:
        groups_rem = 0                       # evenly tiled -> no in-kernel masking

    # VMEM budget: double-buffered input tiles + resident f32 accumulators + headroom.
    x_blk = C * Gt * _GROUP * x_item
    t_blk = Gt * _GROUP * t_item
    out_blk = C * _GROUP * 4
    needed = 2 * (x_blk + t_blk) + 4 * out_blk + (4 << 20)
    vmem_limit = int(min(max(needed, 48 << 20), 112 << 20))
    # TODO(synk): for very large C (x block at the Gt=1 floor no longer fitting ~48 MiB,
    # relevant on v7x's 64 MiB VMEM) add a channel-tiling grid axis; the accumulators
    # are already per-channel so it is a straightforward extension.

    inter_p, union_p = pl.pallas_call(
        functools.partial(_dice_kernel, groups_rem=groups_rem),
        out_shape=(
            jax.ShapeDtypeStruct((N, C, _SUB, _LANE), jnp.float32),
            jax.ShapeDtypeStruct((N, C, _SUB, _LANE), jnp.float32),
        ),
        grid_spec=pltpu.PrefetchScalarGridSpec(
            num_scalar_prefetch=0,
            grid=(N, n_tiles),
            in_specs=[
                pl.BlockSpec((1, C, Gt, _SUB, _LANE), lambda n, g: (n, 0, g, 0, 0)),
                pl.BlockSpec((1, 1, Gt, _SUB, _LANE), lambda n, g: (n, 0, g, 0, 0)),
            ],
            out_specs=[
                # Per-sample, lane/sublane-resident accumulators: invariant over the
                # spatial grid axis; stores are full (8, 128) vregs (no vst.msk).
                pl.BlockSpec((1, C, _SUB, _LANE), lambda n, g: (n, 0, 0, 0)),
                pl.BlockSpec((1, C, _SUB, _LANE), lambda n, g: (n, 0, 0, 0)),
            ],
        ),
        compiler_params=pltpu.CompilerParams(
            # N is megacore-parallel; the spatial (reduction) axis trails as arbitrary.
            # (For N == 1 on v7x a 2-way spatial split would keep both TCs busy.)
            dimension_semantics=("parallel", "arbitrary"),
            vmem_limit_bytes=vmem_limit,
        ),
    )(x5, t5)

    # Tiny epilogue (N*C*1024 f32 each): fold lane/sublane partials, score, mean.
    inter = 2.0 * jnp.sum(inter_p, axis=(2, 3))       # (N, C)
    union = jnp.sum(union_p, axis=(2, 3))             # (N, C)
    score = inter / (union + 1e-10)
    return 1.0 - jnp.mean(score)


def _dice_loss_ref(output, target):
    """Pure-JAX reference mirroring the PyTorch module."""
    C = output.shape[1]
    out32 = output.astype(jnp.float32)
    onehot = jax.nn.one_hot(target[:, 0], C, axis=1, dtype=jnp.float32)
    red = tuple(range(2, output.ndim))
    inter = 2.0 * jnp.sum(out32 * onehot, axis=red)
    union = jnp.sum(out32 ** 2, axis=red) + jnp.sum(onehot ** 2, axis=red)
    score = inter / (union + 1e-10)
    return 1.0 - jnp.mean(score)


if __name__ == "__main__":
    key = jax.random.PRNGKey(0)
    k1, k2, k3, k4, k5, k6 = jax.random.split(key, 6)

    # 1) Main small case (exercises the tiny-input pad path, GR == 1).
    N, C, H, W = 2, 4, 16, 16
    output = jax.random.normal(k1, (N, C, H, W), dtype=jnp.float32)
    target = jax.random.randint(k2, (N, 1, H, W), 0, C, dtype=jnp.int32)
    loss = jax.block_until_ready(dice_loss(output, target))
    ref = jax.block_until_ready(_dice_loss_ref(output, target))
    assert jnp.allclose(loss, ref, atol=1e-5, rtol=1e-5), (loss, ref)

    # 2) Ragged spatial tiling (GR=3, Gt=2 -> masked partial trailing block, no pad).
    out2 = jax.random.normal(k3, (2, 4, 48, 64), dtype=jnp.float32)
    tgt2 = jax.random.randint(k4, (2, 1, 48, 64), 0, 4, dtype=jnp.int32)
    loss2 = jax.block_until_ready(dice_loss(out2, tgt2, x_tile_bytes=32 * 1024))
    ref2 = jax.block_until_ready(_dice_loss_ref(out2, tgt2))
    assert jnp.allclose(loss2, ref2, atol=1e-5, rtol=1e-5), (loss2, ref2)

    # 3) Non-128-multiple spatial size + N=1 (wrapper pad path with -1 labels).
    out3 = jax.random.normal(k5, (1, 3, 10, 10), dtype=jnp.float32)
    tgt3 = jax.random.randint(k6, (1, 1, 10, 10), 0, 3, dtype=jnp.int32)
    loss3 = jax.block_until_ready(dice_loss(out3, tgt3))
    ref3 = jax.block_until_ready(_dice_loss_ref(out3, tgt3))
    assert jnp.allclose(loss3, ref3, atol=1e-5, rtol=1e-5), (loss3, ref3)

    print("KERNEL_OK")
</pallas_src>

<mosaic_0001>
module attributes {stable_mosaic.version = 11 : i64} {
  func.func @_dice_kernel(%arg0: i32, %arg1: i32, %arg2: memref<1x4x1x8x128xf32, #tpu.memory_space<vmem>>, %arg3: memref<1x1x1x8x128xi32, #tpu.memory_space<vmem>>, %arg4: memref<1x4x8x128xf32, #tpu.memory_space<vmem>>, %arg5: memref<1x4x8x128xf32, #tpu.memory_space<vmem>>) attributes {dimension_semantics = [#tpu.dimension_semantics<parallel>, #tpu.dimension_semantics<arbitrary>], iteration_bounds = array<i64: 2, 1>, scalar_prefetch = 0 : i64, scratch_operands = 0 : i64, tpu.core_type = #tpu.core_type<tc>, window_params = [{transform_indices = @transform_0, window_bounds = array<i64: 1, 4, 1, 8, 128>}, {transform_indices = @transform_1, window_bounds = array<i64: 1, 1, 1, 8, 128>}, {transform_indices = @transform_2, window_bounds = array<i64: 1, 4, 8, 128>}, {transform_indices = @transform_3, window_bounds = array<i64: 1, 4, 8, 128>}]} {
    %c0_i32 = arith.constant 0 : i32
    %0 = arith.cmpi eq, %arg1, %c0_i32 : i32
    %1 = arith.extui %0 : i1 to i32
    %c0_i32_0 = arith.constant 0 : i32
    %2 = arith.cmpi ne, %1, %c0_i32_0 : i32
    scf.if %2 {
      %cst_29 = arith.constant 0.000000e+00 : f32
      %24 = vector.broadcast %cst_29 : f32 to vector<1x4x8x128xf32>
      %c0_30 = arith.constant 0 : index
      %c0_31 = arith.constant 0 : index
      %c0_32 = arith.constant 0 : index
      %c0_33 = arith.constant 0 : index
      %25 = vector.load %arg4[%c0_30, %c0_31, %c0_32, %c0_33] : memref<1x4x8x128xf32, #tpu.memory_space<vmem>>, vector<1x4x8x128xf32>
      tpu.vector_store %arg4[%c0_30, %c0_31, %c0_32, %c0_33], %24 {strides = array<i32>} : memref<1x4x8x128xf32, #tpu.memory_space<vmem>>, vector<1x4x8x128xf32>,
      %cst_34 = arith.constant 0.000000e+00 : f32
      %26 = vector.broadcast %cst_34 : f32 to vector<1x4x8x128xf32>
      %c0_35 = arith.constant 0 : index
      %c0_36 = arith.constant 0 : index
      %c0_37 = arith.constant 0 : index
      %c0_38 = arith.constant 0 : index
      %27 = vector.load %arg5[%c0_35, %c0_36, %c0_37, %c0_38] : memref<1x4x8x128xf32, #tpu.memory_space<vmem>>, vector<1x4x8x128xf32>
      tpu.vector_store %arg5[%c0_35, %c0_36, %c0_37, %c0_38], %26 {strides = array<i32>} : memref<1x4x8x128xf32, #tpu.memory_space<vmem>>, vector<1x4x8x128xf32>,
    } else {
    }
    %c0 = arith.constant 0 : index
    %c0_1 = arith.constant 0 : index
    %c0_2 = arith.constant 0 : index
    %c0_3 = arith.constant 0 : index
    %c0_4 = arith.constant 0 : index
    %3 = vector.load %arg2[%c0, %c0_1, %c0_2, %c0_3, %c0_4] : memref<1x4x1x8x128xf32, #tpu.memory_space<vmem>>, vector<1x4x1x8x128xf32>
    %c0_5 = arith.constant 0 : index
    %c0_6 = arith.constant 0 : index
    %c0_7 = arith.constant 0 : index
    %c0_8 = arith.constant 0 : index
    %c0_9 = arith.constant 0 : index
    %4 = vector.load %arg3[%c0_5, %c0_6, %c0_7, %c0_8, %c0_9] : memref<1x1x1x8x128xi32, #tpu.memory_space<vmem>>, vector<1x1x1x8x128xi32>
    %5 = tpu.iota {dimensions = array<i32: 1>} : vector<1x4x1x1x1xi32>
    %6 = vector.broadcast %4 : vector<1x1x1x8x128xi32> to vector<1x4x1x8x128xi32>
    %7 = vector.broadcast %5 : vector<1x4x1x1x1xi32> to vector<1x4x1x8x128xi32>
    %8 = arith.cmpi eq, %6, %7 : vector<1x4x1x8x128xi32>
    %cst = arith.constant 0.000000e+00 : f32
    %9 = vector.broadcast %cst : f32 to vector<1x4x1x8x128xf32>
    %10 = arith.select %8, %3, %9 : vector<1x4x1x8x128xi1>, vector<1x4x1x8x128xf32>
    %c0_10 = arith.constant 0 : index
    %c0_11 = arith.constant 0 : index
    %c0_12 = arith.constant 0 : index
    %c0_13 = arith.constant 0 : index
    %11 = vector.load %arg4[%c0_10, %c0_11, %c0_12, %c0_13] : memref<1x4x8x128xf32, #tpu.memory_space<vmem>>, vector<1x4x8x128xf32>
    %cst_14 = arith.constant dense<0.000000e+00> : vector<1x4x8x128xf32>
    %12 = vector.multi_reduction <add>, %10, %cst_14 [2] : vector<1x4x1x8x128xf32> to vector<1x4x8x128xf32>
    %13 = arith.addf %11, %12 : vector<1x4x8x128xf32>
    %c0_15 = arith.constant 0 : index
    %c0_16 = arith.constant 0 : index
    %c0_17 = arith.constant 0 : index
    %c0_18 = arith.constant 0 : index
    %14 = vector.load %arg4[%c0_15, %c0_16, %c0_17, %c0_18] : memref<1x4x8x128xf32, #tpu.memory_space<vmem>>, vector<1x4x8x128xf32>
    tpu.vector_store %arg4[%c0_15, %c0_16, %c0_17, %c0_18], %13 {strides = array<i32>} : memref<1x4x8x128xf32, #tpu.memory_space<vmem>>, vector<1x4x8x128xf32>,
    %c0_19 = arith.constant 0 : index
    %c0_20 = arith.constant 0 : index
    %c0_21 = arith.constant 0 : index
    %c0_22 = arith.constant 0 : index
    %15 = vector.load %arg5[%c0_19, %c0_20, %c0_21, %c0_22] : memref<1x4x8x128xf32, #tpu.memory_space<vmem>>, vector<1x4x8x128xf32>
    %16 = arith.mulf %3, %3 : vector<1x4x1x8x128xf32>
    %cst_23 = arith.constant dense<0.000000e+00> : vector<1x4x8x128xf32>
    %17 = vector.multi_reduction <add>, %16, %cst_23 [2] : vector<1x4x1x8x128xf32> to vector<1x4x8x128xf32>
    %18 = arith.extui %8 : vector<1x4x1x8x128xi1> to vector<1x4x1x8x128xi32>
    %19 = arith.sitofp %18 : vector<1x4x1x8x128xi32> to vector<1x4x1x8x128xf32>
    %cst_24 = arith.constant dense<0.000000e+00> : vector<1x4x8x128xf32>
    %20 = vector.multi_reduction <add>, %19, %cst_24 [2] : vector<1x4x1x8x128xf32> to vector<1x4x8x128xf32>
    %21 = arith.addf %17, %20 : vector<1x4x8x128xf32>
    %22 = arith.addf %15, %21 : vector<1x4x8x128xf32>
    %c0_25 = arith.constant 0 : index
    %c0_26 = arith.constant 0 : index
    %c0_27 = arith.constant 0 : index
    %c0_28 = arith.constant 0 : index
    %23 = vector.load %arg5[%c0_25, %c0_26, %c0_27, %c0_28] : memref<1x4x8x128xf32, #tpu.memory_space<vmem>>, vector<1x4x8x128xf32>
    tpu.vector_store %arg5[%c0_25, %c0_26, %c0_27, %c0_28], %22 {strides = array<i32>} : memref<1x4x8x128xf32, #tpu.memory_space<vmem>>, vector<1x4x8x128xf32>,
    return
  }
  func.func @transform_0(%arg0: i32, %arg1: i32) -> (i32, i32, i32, i32, i32) {
    %c0_i32 = arith.constant 0 : i32
    %c0_i32_0 = arith.constant 0 : i32
    %c0_i32_1 = arith.constant 0 : i32
    %c0_i32_2 = arith.constant 0 : i32
    return %arg0, %c0_i32, %arg1, %c0_i32_0, %c0_i32_1 : i32, i32, i32, i32, i32
  }
  func.func @transform_1(%arg0: i32, %arg1: i32) -> (i32, i32, i32, i32, i32) {
    %c0_i32 = arith.constant 0 : i32
    %c0_i32_0 = arith.constant 0 : i32
    %c0_i32_1 = arith.constant 0 : i32
    %c0_i32_2 = arith.constant 0 : i32
    return %arg0, %c0_i32, %arg1, %c0_i32_0, %c0_i32_1 : i32, i32, i32, i32, i32
  }
  func.func @transform_2(%arg0: i32, %arg1: i32) -> (i32, i32, i32, i32) {
    %c0_i32 = arith.constant 0 : i32
    %c0_i32_0 = arith.constant 0 : i32
    %c0_i32_1 = arith.constant 0 : i32
    %c0_i32_2 = arith.constant 0 : i32
    return %arg0, %c0_i32, %c0_i32_0, %c0_i32_1 : i32, i32, i32, i32
  }
  func.func @transform_3(%arg0: i32, %arg1: i32) -> (i32, i32, i32, i32) {
    %c0_i32 = arith.constant 0 : i32
    %c0_i32_0 = arith.constant 0 : i32
    %c0_i32_1 = arith.constant 0 : i32
    %c0_i32_2 = arith.constant 0 : i32
    return %arg0, %c0_i32, %c0_i32_0, %c0_i32_1 : i32, i32, i32, i32
  }
}

</mosaic_0001>

<bundles_post_ra>
// kernel: tpu_custom_call.1
= control target key start
LH: loop header
LB: loop body
LE: loop exit
PB: predicated region body
PF: predicated region fallthrough
CT: control target
= control target key end

     0   :  { %9 = vsyncpa [#allocation3], 0  ;;  %s1097_s0 = inlined_call_operand.hbm [shape: f32[2,4,1,8,128], index: 0, kind: input, shape index: {}]   ;;  %s1098_s1 = inlined_call_operand.hbm [shape: s32[2,1,1,8,128], index: 1, kind: input, shape index: {}]   ;;  %s1099_s2 = inlined_call_operand.hbm [shape: f32[2,4,8,128], index: 2, kind: output, shape index: {0}]   ;;  %s1100_s3 = inlined_call_operand.hbm [shape: f32[2,4,8,128], index: 3, kind: output, shape index: {1}]  }
   0x1   :  { %11 = vsyncpa [#allocation3 + $0x1], 0 }
   0x2   :  { %12 = vsyncpa [#allocation6], 0 }
   0x3   :  { %14 = vsyncpa [#allocation6 + $0x1], 0 }
   0x4   :  { %15 = vsyncpa [#allocation4], 0 }
   0x5   :  { %17 = vsyncpa [#allocation4 + $0x1], 0 }
   0x6   :  { %18 = vsyncpa [#allocation9], 0 }
   0x7   :  { %20 = vsyncpa [#allocation9 + $0x1], 0  ;;  %s821_s12 = smov 0   ;;  %s823_s13 = smov 0  }
   0x8   :  { %s825_s14 = smov 0   ;;  %s827_s15 = smov 0  }
   0x9   :  { %s829_s16 = smov 0   ;;  %s831_s17 = smov 0  }
   0xa LB: > { %s506_s18 = sadd.s32 4294967295, %s790_s17   ;;  %s507_s19 = sadd.s32 4294967294, %s790_s17   ;;  %s790_s17 = sphi %s831_s17, %s26_s17   ;;  %s786_s16 = sphi %s829_s16, %s1119_s16   ;;  %s782_s15 = sphi %s827_s15, %s1118_s15   ;;  %s778_s14 = sphi %s825_s14, %s1117_s14   ;;  %s774_s13 = sphi %s823_s13, %s1116_s13   ;;  %s770_s12 = sphi %s821_s12, %s1115_s12  }
   0xb   : > { %s38_s20 = sadd.s32 1, %s786_s16  ;;  %s47_s21 = sadd.s32 1, %s778_s14 }
   0xc   : > { %p40_p0 = scmp.ge.s32.totalorder %s38_s20, 2  ;;  %p54_p1 = scmp.ne.s32.totalorder %s778_s14, %s774_s13 }
   0xd   : > { %p55_p2 = scmp.eq.s32.totalorder %s790_s17, 0  ;;  %p60_p3 = scmp.ne.s32.totalorder %s774_s13, %s770_s12 }
   0xe   : > { %s1121_s20 = smov (%p40_p0, %s38_s20), 0  ;;  %p61_p5 = scmp.eq.s32.totalorder %s506_s18, 0 }
   0xf   : > { %p862_p4 = por %p55_p2, %p54_p1  ;;  %s42_s23 = ssub.s32 %s786_s16, %s1121_s20 }
  0x10   : > { %p112_p6 = scmp.eq.s32.totalorder %s506_s18, 1  ;;  %p45_p7 = scmp.eq.s32.totalorder %s42_s23, 0 }
  0x11   : > { %p868_p8 = por %p61_p5, %p60_p3  ;;  %p118_p10 = scmp.eq.s32.totalorder %s507_s19, 1 }
  0x12   : > { %p872_p9 = por %p112_p6, %p54_p1  ;;  %p557_p13 = scmp.lt.s32.totalorder %s790_s17, 2 }
  0x13   : > { %s1104_s24 = scalar_select %p868_p8, 1, 0 }
  0x14   : > { %s1105_s25 = scalar_select %p872_p9, 1, 0 }
  0x15   : > { %s877_s26 = scalar_select %p45_p7, %s778_s14, %s47_s21  }
  0x16   : > { %p879_p11 = por %p118_p10, %p60_p3  ;;  %s886_s28 = sand.u32 1, %s778_s14  }
  0x17   : > { %s510_s29 = sshll.u32 %s886_s28, 5  ;;  %s532_s30 = sshll.u32 %s786_s16, 9 }
  0x18   : > { %s1106_s27 = scalar_select %p879_p11, 1, 0 }
  0x19   : > { %s893_s6 = scalar_lea.hbm %s1097_s0, %s532_s30  ;;  %s168_s7 = scalar_lea.vmem [#allocation2], %s510_s29 }
  0x1a   : > { %s176_s8 = sshll.u32 %s168_s7, 4  ;;  %p899_p0 = pnand %p557_p13, %p862_p4  ;;  %s895_s8 = int_to_ptr.vmem [resolvable:$true] %s176_s8 }
  0x1b   : > { %s165_s10 = scalar_lea.sflag [#allocation3], %s886_s28  ;;  %s612_s11 = scalar_lea.hbm %s893_s6, 512 }
  0x1c   : > { %p613_p2 = scmp.ne.s32.totalorder %s893_s6, %s612_s11  ;;  %p614_p3 = pneg %p899_p0 }
  0x1d   : > { %s617_s21 = scalar_lea.hbm %s1097_s0, 1024  ;;  %p618_p4 = scmp.lt.u32.totalorder %s893_s6, %s1097_s0 }
  0x1e   : > { %p615_p5 = pnand %p614_p3, %p613_p2  ;;  %p619_p7 = scmp.lt.u32.totalorder %s617_s21, %s612_s11 }
  0x1f   : > { %p621_p13 = scmp.lt.u32.totalorder %s612_s11, %s893_s6 }
  0x20   : > { %p616_p6 = pneg %p615_p5  ;;  %p620_p10 = por %p619_p7, %p618_p4 }
  0x22   : > { %p622_p12 = por %p621_p13, %p620_p10 }
  0x24   : > { %p623_p1 = pnand %p622_p12, %p616_p6 }
  0x26   : > { %626 = shalt.err (!%p623_p1)
}
  0x27   : > { %s627_s29 = scalar_lea.vmem %s895_s8, 512  ;;  %s792_s30 = smov [#allocation2]  }
  0x28   : > { %p628_p2 = scmp.ne.s32.totalorder %s895_s8, %s627_s29  ;;  %s632_s4 = sshll.u32 %s792_s30, 4  ;;  %s633_s4 = int_to_ptr.vmem [resolvable:$false] %s632_s4 }
  0x29   : > { %s634_s5 = scalar_lea.vmem %s633_s4, 1024  ;;  %p635_p9 = scmp.lt.s32.totalorder %s895_s8, %s633_s4 }
  0x2a   : > { %p630_p5 = pnand %p628_p2, %p614_p3  ;;  %p636_p4 = scmp.lt.s32.totalorder %s634_s5, %s627_s29 }
  0x2c   : > { %p631_p11 = pneg %p630_p5  ;;  %p637_p7 = por %p636_p4, %p635_p9 }
  0x2e   : > { %p638_p10 = pnand %p637_p7, %p631_p11 }
  0x30   : > { %641 = shalt.err (!%p638_p10)
}
  0x31   : > { %s793_s7 = smov 128   ;;  %s794_s11 = smov 8  }
  0x32   : > { %546 = dma.hbm_to_vmem [thread:$0]  (!%p899_p0), %s893_s6, 512, %s895_s8, %s165_s10, %s793_s7, %s793_s7, %s794_s11  }
  0x33   : > { %p203_p12 = scmp.lt.s32.totalorder %s790_s17, 3  ;;  %s513_s18 = sshll.u32 %s886_s28, 3 }
  0x34   : > { %s514_s19 = sshll.u32 %s786_s16, 7  ;;  %p1108_p9 = scmp.ge.s32.totalorder %s790_s17, 1 }
  0x35   : > { %s944_s29 = scalar_lea.hbm %s1098_s1, %s514_s19  ;;  %s190_s30 = scalar_lea.vmem [#allocation5], %s513_s18 }
  0x36   : > { %p937_p11 = pnand %p1108_p9, %p203_p12  ;;  %s198_s4 = sshll.u32 %s190_s30, 4  ;;  %s199_s4 = int_to_ptr.vmem [resolvable:$true] %s198_s4 }
  0x37   : > { %s187_s6 = scalar_lea.sflag [#allocation6], %s886_s28  ;;  %s642_s8 = scalar_lea.hbm %s944_s29, 128 }
  0x38   : > { %s1109_s21 = scalar_select %p937_p11, 1, 0 }
  0x39   : > { %p643_p1 = scmp.ne.s32.totalorder %s944_s29, %s642_s8  ;;  %s647_s7 = scalar_lea.hbm %s1098_s1, 256 }
  0x3a   : > { %p648_p2 = scmp.lt.u32.totalorder %s944_s29, %s1098_s1  ;;  %p649_p5 = scmp.lt.u32.totalorder %s647_s7, %s642_s8 }
  0x3b   : > { %p645_p6 = pnand %p643_p1, %p614_p3  ;;  %p651_p7 = scmp.lt.u32.totalorder %s642_s8, %s944_s29 }
  0x3c   : > { %p650_p4 = por %p649_p5, %p648_p2 }
  0x3d   : > { %p646_p13 = pneg %p645_p6 }
  0x3e   : > { %p652_p10 = por %p651_p7, %p650_p4 }
  0x40   : > { %p653_p12 = pnand %p652_p10, %p646_p13 }
  0x42   : > { %656 = shalt.err (!%p653_p12)
}
  0x43   : > { %s657_s28 = scalar_lea.vmem %s199_s4, 128  ;;  %s795_s18 = smov [#allocation5]  }
  0x44   : > { %p658_p9 = scmp.ne.s32.totalorder %s199_s4, %s657_s28  ;;  %s662_s22 = sshll.u32 %s795_s18, 4  ;;  %s663_s22 = int_to_ptr.vmem [resolvable:$false] %s662_s22 }
  0x45   : > { %s664_s23 = scalar_lea.vmem %s663_s22, 256  ;;  %p665_p8 = scmp.lt.s32.totalorder %s199_s4, %s663_s22 }
  0x46   : > { %p660_p1 = pnand %p658_p9, %p614_p3  ;;  %p666_p11 = scmp.lt.s32.totalorder %s664_s23, %s657_s28 }
  0x48   : > { %p661_p6 = pneg %p660_p1  ;;  %p667_p2 = por %p666_p11, %p665_p8 }
  0x4a   : > { %p668_p5 = pnand %p667_p2, %p661_p6 }
  0x4c   : > { %671 = shalt.err (!%p668_p5)
}
  0x4d   : > { %549 = dma.hbm_to_vmem [thread:$0]  (!%p899_p0), %s944_s29, 128, %s199_s4, %s187_s6  }
  0x4e   : > { %p1110_p13 = scmp.ne.s32.totalorder %s1109_s21, 0 }
  0x4f   : > { %s969_s30 = sand.u32 (!%p1110_p13), 1, %s774_s13   ;;  %p1111_p8 = scmp.ne.s32.totalorder (!%p1110_p13), %s1104_s24, 0 }
  0x50   : > { %207 = sbr.rel (%p1110_p13) target bundleno = 142 (0x8e), region = 28  ;;  %s972_s8 = sshll.u32 (!%p1110_p13), %s969_s30, 5 }
  0x51   : > { %s210_s10 = scalar_lea.sflag (!%p1110_p13), [#allocation3], %s969_s30  ;;  %s213_s5 = scalar_lea.vmem (!%p1110_p13), [#allocation2], %s972_s8 }
  0x57   : > { %753 = dma.done.wait (%p1111_p8), %s210_s10, 512  }
  0x58   : > { %755 = vsyncadd (%p1111_p8), %s210_s10, 4294966784  ;;  %s517_s9 = sshll.u32 %s969_s30, 3  ;;  %s219_s21 = scalar_lea.sflag [#allocation6], %s969_s30 }
  0x59   : > { %s222_s29 = scalar_lea.vmem [#allocation5], %s517_s9 }
  0x5a   : > { %757 = dma.done.wait (%p1111_p8), %s219_s21, 128  }
  0x5b   : > { %759 = vsyncadd (%p1111_p8), %s219_s21, 4294967168  ;;  %v267_v0 = vld [vmem:[%s213_s5] sm:$0xff]  ;;  %v268_v2 = vld [vmem:[%s213_s5 + $0x8] sm:$0xff]  ;;  %s533_s4 = sshll.u32 %s782_s15, 9  ;;  %s247_s6 = scalar_lea.vmem [#allocation7], %s972_s8  ;;  %v796_v13 = vmov 0.0  }
  0x5c   : > { %v271_v1 = vld [vmem:[%s222_s29] sm:$0xff]  ;;  %v300_v3 = vmul.f32 %v267_v0, %v267_v0  ;;  %v301_v4 = vmul.f32 %v268_v2, %v268_v2  ;;  %v269_v5 = vld [vmem:[%s213_s5 + $0x10] sm:$0xff]  ;;  %v270_v6 = vld [vmem:[%s213_s5 + $0x18] sm:$0xff]  ;;  %s351_s7 = sshll.u32 %s247_s6, 4  ;;  %s996_s19 = scalar_lea.hbm %s1099_s2, %s533_s4  ;;  %s998_s7 = int_to_ptr.vmem [resolvable:$true] %s351_s7 }
  0x5d   : > { %vm272_vm0 = vcmp.eq.s32.totalorder %v271_v1, 0  ;;  %vm273_vm1 = vcmp.eq.s32.totalorder %v271_v1, 1  ;;  %vm274_vm2 = vcmp.eq.s32.totalorder %v271_v1, 2  ;;  %v302_v9 = vmul.f32 %v269_v5, %v269_v5  ;;  %s1002_s28 = scalar_lea.vmem [#allocation8], %s972_s8  ;;  %s333_s22 = scalar_lea.sflag [#allocation4], %s969_s30 }
  0x5e   : > { %v276_v7 = vsel %vm272_vm0, %v267_v0, 0.0  ;;  %v277_v8 = vsel %vm273_vm1, %v268_v2, 0.0  ;;  %v278_v10 = vsel %vm274_vm2, %v269_v5, 0.0  ;;  %vm275_vm3 = vcmp.eq.s32.totalorder %v271_v1, 3  ;;  %s367_s18 = sshll.u32 %s1002_s28, 4  ;;  %s672_s23 = scalar_lea.vmem %s998_s7, 512  ;;  %s1042_s18 = int_to_ptr.vmem [resolvable:$true] %s367_s18 }
  0x5f   : > { %v279_v11 = vsel %vm275_vm3, %v270_v6, 0.0  ;;  %v303_v12 = vmul.f32 %v270_v6, %v270_v6  ;;  %v520_v14 = vsel %vm272_vm0, 1.0, %v796_v13  ;;  %292 = vst [vmem:[%s247_s6] sm:$0xff] %v276_v7  ;;  %293 = vst [vmem:[%s247_s6 + $0x8] sm:$0xff] %v277_v8  ;;  %v521_v16 = vsel %vm273_vm1, 1.0, %v796_v13  ;;  %p673_p0 = scmp.ne.s32.totalorder %s998_s7, %s672_s23  ;;  %p1112_p3 = scmp.ne.s32.totalorder %s1105_s25, 0 }
  0x60   : > { %v320_v15 = vadd.f32 %v520_v14, %v300_v3  ;;  %v522_v17 = vsel %vm274_vm2, 1.0, %v796_v13  ;;  %294 = vst [vmem:[%s247_s6 + $0x10] sm:$0xff] %v278_v10  ;;  %v321_v18 = vadd.f32 %v521_v16, %v301_v4  ;;  %v523_v20 = vsel %vm275_vm3, 1.0, %v796_v13  ;;  %295 = vst [vmem:[%s247_s6 + $0x18] sm:$0xff] %v279_v11  ;;  %s797_s10 = smov [#allocation7]  }
  0x61   : > { %v322_v19 = vadd.f32 %v522_v17, %v302_v9  ;;  %v323_v21 = vadd.f32 %v523_v20, %v303_v12  ;;  %p674_p11 = pnand %p673_p0, %p1112_p3  ;;  %s676_s5 = sshll.u32 %s797_s10, 4  ;;  %s677_s5 = int_to_ptr.vmem [resolvable:$false] %s676_s5 }
  0x62   : > { %s678_s9 = scalar_lea.vmem %s677_s5, 1024  ;;  %p679_p7 = scmp.lt.s32.totalorder %s998_s7, %s677_s5 }
  0x63   : > { %p675_p4 = pneg %p674_p11  ;;  %p680_p10 = scmp.lt.s32.totalorder %s678_s9, %s672_s23 }
  0x65   : > { %p681_p12 = por %p680_p10, %p679_p7 }
  0x67   : > { %p682_p9 = pnand %p681_p12, %p675_p4 }
  0x69   : > { %685 = shalt.err (!%p682_p9)
}
  0x6a   : > { %s686_s8 = scalar_lea.hbm %s996_s19, 512  ;;  %s690_s6 = scalar_lea.hbm %s1099_s2, 1024 }
  0x6b   : > { %p687_p1 = scmp.ne.s32.totalorder %s996_s19, %s686_s8  ;;  %p691_p5 = scmp.lt.u32.totalorder %s996_s19, %s1099_s2 }
  0x6c   : > { %p692_p13 = scmp.lt.u32.totalorder %s690_s6, %s686_s8  ;;  %p694_p0 = scmp.lt.u32.totalorder %s686_s8, %s996_s19 }
  0x6d   : > { %p688_p6 = pnand %p687_p1, %p1112_p3 }
  0x6e   : > { %p693_p8 = por %p692_p13, %p691_p5 }
  0x6f   : > { %p689_p2 = pneg %p688_p6 }
  0x70   : > { %p695_p11 = por %p694_p0, %p693_p8 }
  0x72   : > { %p696_p4 = pnand %p695_p11, %p689_p2 }
  0x74   : > { %699 = shalt.err (!%p696_p4)
}
  0x75   : > { %s798_s23 = smov 128   ;;  %s799_s10 = smov 8   ;;  %328 = vst [vmem:[%s1002_s28] sm:$0xff] %v320_v15  ;;  %329 = vst [vmem:[%s1002_s28 + $0x8] sm:$0xff] %v321_v18 }
  0x76   : > { %539 = dma.vmem_to_hbm [thread:$0]  (%p1112_p3), %s998_s7, 512, %s996_s19, %s333_s22, %s798_s23, %s798_s23, %s799_s10  }
  0x77   : > { %s1038_s8 = scalar_lea.hbm %s1100_s3, %s533_s4  ;;  %330 = vst [vmem:[%s1002_s28 + $0x10] sm:$0xff] %v322_v19  ;;  %331 = vst [vmem:[%s1002_s28 + $0x18] sm:$0xff] %v323_v21  ;;  %s338_s21 = scalar_lea.sflag [#allocation9], %s969_s30 }
  0x78   : > { %s700_s29 = scalar_lea.vmem %s1042_s18, 512  ;;  %s800_s15 = smov [#allocation8]  }
  0x79   : > { %p701_p7 = scmp.ne.s32.totalorder %s1042_s18, %s700_s29  ;;  %s704_s7 = sshll.u32 %s800_s15, 4  ;;  %s705_s7 = int_to_ptr.vmem [resolvable:$false] %s704_s7 }
  0x7a   : > { %s706_s4 = scalar_lea.vmem %s705_s7, 1024  ;;  %p707_p9 = scmp.lt.s32.totalorder %s1042_s18, %s705_s7 }
  0x7b   : > { %p702_p10 = pnand %p701_p7, %p1112_p3  ;;  %p708_p1 = scmp.lt.s32.totalorder %s706_s4, %s700_s29 }
  0x7d   : > { %p703_p12 = pneg %p702_p10  ;;  %p709_p6 = por %p708_p1, %p707_p9 }
  0x7f   : > { %p710_p2 = pnand %p709_p6, %p703_p12 }
  0x81   : > { %713 = shalt.err (!%p710_p2)
}
  0x82   : > { %s714_s19 = scalar_lea.hbm %s1038_s8, 512  ;;  %s718_s6 = scalar_lea.hbm %s1100_s3, 1024 }
  0x83   : > { %p715_p5 = scmp.ne.s32.totalorder %s1038_s8, %s714_s19  ;;  %p719_p0 = scmp.lt.u32.totalorder %s1038_s8, %s1100_s3 }
  0x84   : > { %p720_p11 = scmp.lt.u32.totalorder %s718_s6, %s714_s19  ;;  %p722_p7 = scmp.lt.u32.totalorder %s714_s19, %s1038_s8 }
  0x85   : > { %p716_p13 = pnand %p715_p5, %p1112_p3 }
  0x86   : > { %p721_p4 = por %p720_p11, %p719_p0 }
  0x87   : > { %p717_p8 = pneg %p716_p13 }
  0x88   : > { %p723_p10 = por %p722_p7, %p721_p4 }
  0x8a   : > { %p724_p12 = pnand %p723_p10, %p717_p8 }
  0x8c   : > { %727 = shalt.err (!%p724_p12)
}
  0x8d   : > { %540 = dma.vmem_to_hbm [thread:$0]  (%p1112_p3), %s1042_s18, 512, %s1038_s8, %s338_s21, %s798_s23, %s798_s23, %s799_s10  }
  0x8e PF: > { %s382_s5 = sand.u32 1, %s770_s12   ;;  %p1113_p9 = scmp.ne.s32.totalorder %s1106_s27, 0 }
  0x8f   : > { %p1114_p1 = scmp.ge.s32.totalorder %s790_s17, 2  ;;  %s383_s9 = scalar_lea.sflag [#allocation4], %s382_s5 }
  0x91   : > { %p551_p6 = pnand %p1114_p1, %p1113_p9 }
  0x93   : > { %761 = dma.done.wait (!%p551_p6), %s383_s9, 512  }
  0x94   : > { %763 = vsyncadd (!%p551_p6), %s383_s9, 4294966784  ;;  %s392_s25 = scalar_lea.sflag [#allocation9], %s382_s5 }
  0x95   : > { %765 = dma.done.wait (!%p551_p6), %s392_s25, 512  }
  0x96   : > { %767 = vsyncadd (!%p551_p6), %s392_s25, 4294966784  ;;  %s26_s17 = sadd.s32 1, %s790_s17   ;;  %s1115_s12 = smov %s774_s13 }
  0x97   : > { %p23_p2 = scmp.ge.s32.totalorder %s26_s17, 4   ;;  %s1116_s13 = smov %s778_s14 }
  0x98   : > { %s1117_s14 = smov %s877_s26  ;;  %s1118_s15 = smov %s786_s16 }
  0x99   : > { %s1119_s16 = smov %s1121_s20  ;;  %25 = sbr.rel (!%p23_p2) target bundleno = 10 (0xa), region = 107 }
  0xa0   :  { %397 = vsyncpa [#allocation3], 1 }
  0xa1   :  { %399 = vsyncpa [#allocation3 + $0x1], 1 }
  0xa2   :  { %400 = vsyncpa [#allocation6], 1 }
  0xa3   :  { %402 = vsyncpa [#allocation6 + $0x1], 1 }
  0xa4   :  { %403 = vsyncpa [#allocation4], 1 }
  0xa5   :  { %405 = vsyncpa [#allocation4 + $0x1], 1 }
  0xa6   :  { %406 = vsyncpa [#allocation9], 1 }
  0xa7   :  { %408 = vsyncpa [#allocation9 + $0x1], 1 }

</bundles_post_ra>
